<compile_context>
chip_gen: v5e
topology: v5e:2x2
jax: 0.10.0
libtpu: 0.0.40
codegen_flags: <defaults>
</compile_context>

<pallas_src>
import functools

import jax
import jax.numpy as jnp
from jax import lax
from jax.experimental import pallas as pl
from jax.experimental.pallas import tpu as pltpu

LANES = 128
_MAX_TILE_ROWS = 8192      # 4 MiB of f32 per stream per grid step
_MIN_TILE_ROWS = 256


# ------------------------------ small utils --------------------------------- #

def _cdiv(a, b):
    return -(-a // b)


def _round_up(a, m):
    return _cdiv(a, m) * m


def _vmem_capacity_bytes():
    """Physical VMEM per TensorCore; conservative fallback if unqueryable."""
    try:
        cap = int(pltpu.get_tpu_info().vmem_capacity_bytes)
        if cap > 0:
            return cap
    except Exception:
        pass
    return 64 * 1024 * 1024    # v7x per-TC value (smallest across v5e/v6e/v7x)


# ------------------------------ math helpers -------------------------------- #

def _pow_gamma(base, gamma):
    """base**gamma, specialized to repeated multiplies for small int gamma."""
    g = float(gamma)
    if g == int(g) and 0 <= int(g) <= 8:
        gi = int(g)
        if gi == 0:
            return jnp.ones_like(base)
        r = base
        for _ in range(gi - 1):
            r = r * base
        return r
    return jnp.power(base, jnp.float32(g))   # non-integer gamma: real pow (EUP)


def _focal_math(x, t, *, alpha, gamma, d):
    """Elementwise focal loss, computed in f32 regardless of input dtype."""
    x = jnp.clip(x.astype(jnp.float32), 1e-4, 1.0 - 1e-4)
    pos = t.astype(jnp.float32) > jnp.float32(d)
    one_minus_x = 1.0 - x
    p_t = jnp.where(pos, x, one_minus_x)
    one_minus_pt = jnp.where(pos, one_minus_x, x)
    modulator = _pow_gamma(one_minus_pt, gamma)
    log_pt = jnp.log(p_t)                           # EUP slot (free vs VPU)
    if float(alpha) == 1.0:
        return -(modulator * log_pt)                # fold the -1; no alpha select
    scale = jnp.where(pos, jnp.float32(-float(alpha)), jnp.float32(-1.0))
    return scale * modulator * log_pt               # == where(pos, fl*alpha, fl)


# -------------------------------- kernels ------------------------------------ #

def _focal_sum_kernel(x_ref, t_ref, out_ref, *, alpha, gamma, d,
                      tiles_per_chunk, num_tiles, acc_rows, tail_valid):
    # grid = (chunks [parallel, for 2-TC sharding], tiles [arbitrary reduction])
    i = pl.program_id(1)
    tile = pl.program_id(0) * tiles_per_chunk + i

    # Output block index depends only on the chunk axis -> it stays resident
    # across the reduction axis; accumulate directly into it (no scratch).
    @pl.when(i == 0)
    def _init():
        out_ref[...] = jnp.zeros_like(out_ref)

    fl = _focal_math(x_ref[...], t_ref[...], alpha=alpha, gamma=gamma, d=d)

    def _accumulate(vals):
        # lane-shaped partial sums: pure vreg adds when acc_rows == 8
        if acc_rows == 1:
            out_ref[...] += vals.sum(axis=0, keepdims=True)
        else:
            out_ref[...] += vals.reshape(-1, acc_rows, LANES).sum(axis=0)

    if tail_valid is None:
        # Every covered element is valid; only skip the (at most one) dummy
        # iteration produced by an uneven chunk split.
        @pl.when(tile < num_tiles)
        def _acc():
            _accumulate(fl)
    else:
        last = num_tiles - 1

        @pl.when(tile < last)
        def _acc_full():
            _accumulate(fl)

        @pl.when(tile == last)
        def _acc_tail():
            # Mask lane-padding and out-of-bounds rows of the partial tile.
            flat = (lax.broadcasted_iota(jnp.int32, fl.shape, 0) * LANES
                    + lax.broadcasted_iota(jnp.int32, fl.shape, 1))
            _accumulate(jnp.where(flat < tail_valid, fl, 0.0))


def _focal_elementwise_kernel(x_ref, t_ref, out_ref, *, alpha, gamma, d):
    fl = _focal_math(x_ref[...], t_ref[...], alpha=alpha, gamma=gamma, d=d)
    out_ref[...] = fl.astype(out_ref.dtype)


# -------------------------------- wrapper ------------------------------------ #

def _pick_tile_rows(rows, stream_bytes_per_row, vmem_cap):
    """Row tile for the lane-dense (rows, 128) slab.

    Sized from the chip's VMEM: double-buffered streams plus in-kernel f32
    temporaries must stay within ~half of physical VMEM (64 MiB/TC on v7x,
    128 MiB on v5e/v6e).  Rows kept a multiple of 32 so bf16/int8 inputs stay
    sublane-pack aligned; small inputs get one full-extent block.
    """
    per_row = 2 * stream_bytes_per_row + 4 * LANES * 4
    cap = (vmem_cap // 2) // per_row
    cap = max(_MIN_TILE_ROWS, min(cap, _MAX_TILE_ROWS))
    cap -= cap % 32
    if rows < 512:
        return rows                      # single full-extent block
    # at least two tiles so the chunked reduction / parallel grid can be
    # sharded across both TensorCores on v7x
    return min(cap, _round_up(_cdiv(rows, 2), 32))


def focal_loss(x, target, d=0, *, alpha=1, gamma=2, reduction="mean",
               max_rows_per_tile=None):
    """Focal loss matching the PyTorch FocalLoss.forward (clamp "sigmoid")."""
    if reduction not in ("mean", "sum", "none"):
        raise NotImplementedError(f"Reduction {reduction} not implemented.")

    orig_shape = x.shape
    total = int(x.size)

    if target.dtype == jnp.bool_:          # bool refs are awkward on TPU
        target = target.astype(jnp.int8)

    # Flatten row-major to a lane-dense (rows, 128) slab.  Pad the (at most
    # 127) trailing elements so the reshape is exact; padded / out-of-bounds
    # elements are masked out of the reduction and sliced off the elementwise
    # output, so the pad value never matters.
    rows = _cdiv(total, LANES)
    padded = rows * LANES
    xf = x.reshape(-1)
    tf = target.reshape(-1)
    if padded != total:
        xf = jnp.pad(xf, (0, padded - total))
        tf = jnp.pad(tf, (0, padded - total))
    x2 = xf.reshape(rows, LANES)
    t2 = tf.reshape(rows, LANES)

    vmem_cap = _vmem_capacity_bytes()
    out_bytes = x.dtype.itemsize if reduction == "none" else 0
    stream_bytes_per_row = LANES * (x2.dtype.itemsize + t2.dtype.itemsize
                                    + out_bytes)
    tm = _pick_tile_rows(rows, stream_bytes_per_row, vmem_cap)
    if max_rows_per_tile is not None:      # test/tuning hook
        tm = min(tm, max(1, int(max_rows_per_tile)))
        if tm != rows and tm % 8 != 0:
            tm = max(8, tm - tm % 8)       # keep (8, 128) block alignment
    num_tiles = _cdiv(rows, tm)

    # Explicit scoped-VMEM limit: big tiles exceed v5e's 16 MiB default; keep
    # headroom vs. physical capacity (64 MiB/TC on v7x).
    vmem_limit = int(min(vmem_cap,
                         max(16 << 20,
                             2 * stream_bytes_per_row * tm
                             + 4 * tm * LANES * 4 + (2 << 20))))
    kwargs = dict(alpha=float(alpha), gamma=float(gamma), d=float(d))
    cost = pl.CostEstimate(flops=10 * total, transcendentals=total,
                           bytes_accessed=int(stream_bytes_per_row) * rows)

    if reduction == "none":
        kern = functools.partial(_focal_elementwise_kernel, **kwargs)
        out2 = pl.pallas_call(
            kern,
            out_shape=jax.ShapeDtypeStruct((rows, LANES), x.dtype),
            grid_spec=pltpu.PrefetchScalarGridSpec(
                num_scalar_prefetch=0,
                grid=(num_tiles,),
                in_specs=[pl.BlockSpec((tm, LANES), lambda i: (i, 0)),
                          pl.BlockSpec((tm, LANES), lambda i: (i, 0))],
                out_specs=pl.BlockSpec((tm, LANES), lambda i: (i, 0)),
            ),
            compiler_params=pltpu.CompilerParams(
                dimension_semantics=("parallel",),
                vmem_limit_bytes=vmem_limit),
            cost_estimate=cost,
        )(x2, t2)
        out_flat = out2.reshape(-1)
        if padded != total:
            out_flat = out_flat[:total]
        return out_flat.reshape(orig_shape)

    # sum / mean: 2-D grid (chunks for 2-TC sharding on v7x, reduction tiles).
    num_chunks = 2 if num_tiles >= 2 else 1
    tpc = _cdiv(num_tiles, num_chunks)
    acc_rows = 8 if tm % 8 == 0 else 1
    covered = num_tiles * tm * LANES
    tail_valid = None if covered == total else total - (num_tiles - 1) * tm * LANES

    def tile_map(c, i):
        # Clamp the (at most one) dummy iteration of an uneven chunk split to
        # an in-bounds block; its contribution is skipped inside the kernel.
        return (jnp.minimum(c * tpc + i, num_tiles - 1), 0)

    kern = functools.partial(_focal_sum_kernel, tiles_per_chunk=tpc,
                             num_tiles=num_tiles, acc_rows=acc_rows,
                             tail_valid=tail_valid, **kwargs)
    partials = pl.pallas_call(
        kern,
        out_shape=jax.ShapeDtypeStruct((num_chunks, acc_rows, LANES),
                                       jnp.float32),
        grid_spec=pltpu.PrefetchScalarGridSpec(
            num_scalar_prefetch=0,
            grid=(num_chunks, tpc),
            in_specs=[pl.BlockSpec((tm, LANES), tile_map),
                      pl.BlockSpec((tm, LANES), tile_map)],
            out_specs=pl.BlockSpec((None, acc_rows, LANES),
                                   lambda c, i: (c, 0, 0)),
        ),
        compiler_params=pltpu.CompilerParams(
            dimension_semantics=("parallel", "arbitrary"),
            vmem_limit_bytes=vmem_limit),
        cost_estimate=cost,
    )(x2, t2)

    total_sum = jnp.sum(partials)          # tiny (chunks, 8, 128) collapse in XLA
    if reduction == "sum":
        return total_sum
    return total_sum / jnp.float32(total)  # mean


# ------------------------------- reference ----------------------------------- #

def focal_loss_ref(x, target, d=0, *, alpha=1, gamma=2, reduction="mean"):
    """Pure-JAX transliteration of the PyTorch module (f32 math)."""
    xc = jnp.clip(x.astype(jnp.float32), 1e-4, 1.0 - 1e-4)
    t = target.astype(jnp.float32)
    pos = t > jnp.float32(d)
    p_t = jnp.where(pos, xc, 1.0 - xc)
    fl = -1.0 * jnp.power(1.0 - p_t, float(gamma)) * jnp.log(p_t)
    fl = jnp.where(pos, fl * float(alpha), fl)
    if reduction == "mean":
        return fl.mean()
    if reduction == "sum":
        return fl.sum()
    return fl


# ---------------------------------- main -------------------------------------- #

if __name__ == "__main__":
    key = jax.random.PRNGKey(0)
    k1, k2, k3, k4, k5, k6 = jax.random.split(key, 6)

    # --- A: f32 NCHW, all reductions ----------------------------------------- #
    B, C, H, W = 2, 4, 16, 16
    x = jax.random.uniform(k1, (B, C, H, W), dtype=jnp.float32)
    t = (jax.random.uniform(k2, (B, C, H, W)) > 0.7).astype(jnp.float32)
    for red in ("mean", "sum", "none"):
        out = jax.block_until_ready(focal_loss(x, t, d=0, reduction=red))
        ref = focal_loss_ref(x, t, d=0, reduction=red)
        assert jnp.allclose(out, ref, rtol=1e-4, atol=1e-4), (red, out, ref)

    # --- B: narrow dtypes (bf16 scores, int8 targets), alpha != 1 ------------ #
    xb = jax.random.uniform(k3, (2, 4, 32, 16),
                            dtype=jnp.float32).astype(jnp.bfloat16)
    tb = (jax.random.uniform(k4, (2, 4, 32, 16)) > 0.6).astype(jnp.int8)
    out_b = jax.block_until_ready(
        focal_loss(xb, tb, alpha=0.25, gamma=2, reduction="mean"))
    ref_b = focal_loss_ref(xb, tb, alpha=0.25, gamma=2, reduction="mean")
    assert jnp.allclose(out_b, ref_b, rtol=1e-3, atol=1e-3), (out_b, ref_b)

    # --- C: ragged shape (lane padding + tail mask) and forced multi-tile ----- #
    xc = jax.random.uniform(k5, (2, 3, 100, 100), dtype=jnp.float32)
    tc = (jax.random.uniform(k6, (2, 3, 100, 100)) > 0.5).astype(jnp.float32)
    for red in ("mean", "sum", "none"):
        out = jax.block_until_ready(
            focal_loss(xc, tc, reduction=red, max_rows_per_tile=64))
        ref = focal_loss_ref(xc, tc, reduction=red)
        assert jnp.allclose(out, ref, rtol=1e-4, atol=1e-4), (red, out, ref)
    # default tiling on the same ragged shape (single partial-block path)
    out_c = jax.block_until_ready(focal_loss(xc, tc, reduction="mean"))
    ref_c = focal_loss_ref(xc, tc, reduction="mean")
    assert jnp.allclose(out_c, ref_c, rtol=1e-4, atol=1e-4), (out_c, ref_c)

    print("KERNEL_OK")
</pallas_src>

<mosaic_0001>
module attributes {stable_mosaic.version = 11 : i64} {
  func.func @_focal_sum_kernel(%arg0: i32, %arg1: i32, %arg2: memref<16x128xf32, #tpu.memory_space<vmem>>, %arg3: memref<16x128xf32, #tpu.memory_space<vmem>>, %arg4: memref<1x8x128xf32, #tpu.memory_space<vmem>>) attributes {dimension_semantics = [#tpu.dimension_semantics<parallel>, #tpu.dimension_semantics<arbitrary>], iteration_bounds = array<i64: 1, 1>, scalar_prefetch = 0 : i64, scratch_operands = 0 : i64, tpu.core_type = #tpu.core_type<tc>, window_params = [{transform_indices = @transform_0, window_bounds = array<i64: 16, 128>}, {transform_indices = @transform_1, window_bounds = array<i64: 16, 128>}, {transform_indices = @transform_2, window_bounds = array<i64: 1, 8, 128>}]} {
    %c1_i32 = arith.constant 1 : i32
    %0 = arith.muli %arg0, %c1_i32 : i32
    %1 = arith.addi %0, %arg1 : i32
    %c0_i32 = arith.constant 0 : i32
    %2 = arith.cmpi eq, %arg1, %c0_i32 : i32
    %3 = arith.extui %2 : i1 to i32
    %c0_i32_0 = arith.constant 0 : i32
    %4 = arith.cmpi ne, %3, %c0_i32_0 : i32
    scf.if %4 {
      %cst_10 = arith.constant 0.000000e+00 : f32
      %25 = vector.broadcast %cst_10 : f32 to vector<8x128xf32>
      %c0_11 = arith.constant 0 : index
      %c0_12 = arith.constant 0 : index
      %c0_13 = arith.constant 0 : index
      %26 = vector.load %arg4[%c0_11, %c0_12, %c0_13] : memref<1x8x128xf32, #tpu.memory_space<vmem>>, vector<1x8x128xf32>
      %27 = vector.shape_cast %26 : vector<1x8x128xf32> to vector<8x128xf32>
      %28 = vector.shape_cast %25 : vector<8x128xf32> to vector<1x8x128xf32>
      tpu.vector_store %arg4[%c0_11, %c0_12, %c0_13], %28 {strides = array<i32>} : memref<1x8x128xf32, #tpu.memory_space<vmem>>, vector<1x8x128xf32>,
    } else {
    }
    %c0 = arith.constant 0 : index
    %c0_1 = arith.constant 0 : index
    %5 = vector.load %arg2[%c0, %c0_1] : memref<16x128xf32, #tpu.memory_space<vmem>>, vector<16x128xf32>
    %c0_2 = arith.constant 0 : index
    %c0_3 = arith.constant 0 : index
    %6 = vector.load %arg3[%c0_2, %c0_3] : memref<16x128xf32, #tpu.memory_space<vmem>>, vector<16x128xf32>
    %cst = arith.constant 9.99999974E-5 : f32
    %cst_4 = arith.constant 0.999899983 : f32
    %7 = vector.broadcast %cst : f32 to vector<16x128xf32>
    %8 = arith.maximumf %7, %5 : vector<16x128xf32>
    %9 = vector.broadcast %cst_4 : f32 to vector<16x128xf32>
    %10 = arith.minimumf %9, %8 : vector<16x128xf32>
    %cst_5 = arith.constant 0.000000e+00 : f32
    %11 = vector.broadcast %cst_5 : f32 to vector<16x128xf32>
    %12 = arith.cmpf ogt, %6, %11 : vector<16x128xf32>
    %cst_6 = arith.constant 1.000000e+00 : f32
    %13 = vector.broadcast %cst_6 : f32 to vector<16x128xf32>
    %14 = arith.subf %13, %10 : vector<16x128xf32>
    %15 = arith.select %12, %10, %14 : vector<16x128xi1>, vector<16x128xf32>
    %16 = arith.select %12, %14, %10 : vector<16x128xi1>, vector<16x128xf32>
    %17 = arith.mulf %16, %16 : vector<16x128xf32>
    %18 = math.log %15 : vector<16x128xf32>
    %19 = arith.mulf %17, %18 : vector<16x128xf32>
    %cst_7 = arith.constant 0.000000e+00 : f32
    %20 = vector.broadcast %cst_7 : f32 to vector<16x128xf32>
    %21 = arith.subf %20, %19 : vector<16x128xf32>
    %c1_i32_8 = arith.constant 1 : i32
    %22 = arith.cmpi slt, %1, %c1_i32_8 : i32
    %23 = arith.extui %22 : i1 to i32
    %c0_i32_9 = arith.constant 0 : i32
    %24 = arith.cmpi ne, %23, %c0_i32_9 : i32
    scf.if %24 {
      %c0_10 = arith.constant 0 : index
      %c0_11 = arith.constant 0 : index
      %c0_12 = arith.constant 0 : index
      %25 = vector.load %arg4[%c0_10, %c0_11, %c0_12] : memref<1x8x128xf32, #tpu.memory_space<vmem>>, vector<1x8x128xf32>
      %26 = vector.shape_cast %25 : vector<1x8x128xf32> to vector<8x128xf32>
      %27 = vector.shape_cast %21 : vector<16x128xf32> to vector<2x8x128xf32>
      %cst_13 = arith.constant dense<0.000000e+00> : vector<8x128xf32>
      %28 = vector.multi_reduction <add>, %27, %cst_13 [0] : vector<2x8x128xf32> to vector<8x128xf32>
      %29 = arith.addf %26, %28 : vector<8x128xf32>
      %c0_14 = arith.constant 0 : index
      %c0_15 = arith.constant 0 : index
      %c0_16 = arith.constant 0 : index
      %30 = vector.load %arg4[%c0_14, %c0_15, %c0_16] : memref<1x8x128xf32, #tpu.memory_space<vmem>>, vector<1x8x128xf32>
      %31 = vector.shape_cast %30 : vector<1x8x128xf32> to vector<8x128xf32>
      %32 = vector.shape_cast %29 : vector<8x128xf32> to vector<1x8x128xf32>
      tpu.vector_store %arg4[%c0_14, %c0_15, %c0_16], %32 {strides = array<i32>} : memref<1x8x128xf32, #tpu.memory_space<vmem>>, vector<1x8x128xf32>,
    } else {
    }
    return
  }
  func.func @transform_0(%arg0: i32, %arg1: i32) -> (i32, i32) {
    %c1_i32 = arith.constant 1 : i32
    %0 = arith.muli %arg0, %c1_i32 : i32
    %1 = arith.addi %0, %arg1 : i32
    %c0_i32 = arith.constant 0 : i32
    %2 = arith.minsi %1, %c0_i32 : i32
    %c0_i32_0 = arith.constant 0 : i32
    %c0_i32_1 = arith.constant 0 : i32
    return %2, %c0_i32_0 : i32, i32
  }
  func.func @transform_1(%arg0: i32, %arg1: i32) -> (i32, i32) {
    %c1_i32 = arith.constant 1 : i32
    %0 = arith.muli %arg0, %c1_i32 : i32
    %1 = arith.addi %0, %arg1 : i32
    %c0_i32 = arith.constant 0 : i32
    %2 = arith.minsi %1, %c0_i32 : i32
    %c0_i32_0 = arith.constant 0 : i32
    %c0_i32_1 = arith.constant 0 : i32
    return %2, %c0_i32_0 : i32, i32
  }
  func.func @transform_2(%arg0: i32, %arg1: i32) -> (i32, i32, i32) {
    %c0_i32 = arith.constant 0 : i32
    %c0_i32_0 = arith.constant 0 : i32
    %c0_i32_1 = arith.constant 0 : i32
    return %arg0, %c0_i32, %c0_i32_0 : i32, i32, i32
  }
}

</mosaic_0001>

<bundles_post_ra>
// kernel: tpu_custom_call.1
= control target key start
LH: loop header
LB: loop body
LE: loop exit
PB: predicated region body
PF: predicated region fallthrough
CT: control target
= control target key end

     0   :  { %7 = vsyncpa [#allocation3], 0  ;;  %s243_s0 = inlined_call_operand.hbm [shape: f32[16,128], index: 0, kind: input, shape index: {}]   ;;  %s244_s1 = inlined_call_operand.hbm [shape: f32[16,128], index: 1, kind: input, shape index: {}]   ;;  %s245_s2 = inlined_call_operand.hbm [shape: f32[1,8,128], index: 2, kind: output, shape index: {}]  }
   0x1   :  { %8 = vsyncpa [#allocation6], 0 }
   0x2   :  { %9 = vsyncpa [#allocation4], 0  ;;  %s20_s11 = sshll.u32 %s243_s0, 4  ;;  %s214_s12 = smov [#allocation2]   ;;  %s21_s11 = int_to_ptr.hbm [resolvable:$true] %s20_s11 }
   0x3   :  { %s22_s13 = sshll.u32 %s214_s12, 4  ;;  %s39_s16 = sshll.u32 %s244_s1, 4  ;;  %s23_s13 = int_to_ptr.vmem [resolvable:$true] %s22_s13  ;;  %s40_s16 = int_to_ptr.hbm [resolvable:$true] %s39_s16 }
   0x4   :  { %s215_s17 = smov 128   ;;  %s216_s18 = smov 8  }
   0x5   :  { %28 = dma.hbm_to_vmem [thread:$0]  %s21_s11, 256, %s23_s13, [#allocation3], %s215_s17, %s215_s17, %s216_s18  }
   0x6   :  { %s217_s19 = smov [#allocation5]  }
   0x7   :  { %s41_s20 = sshll.u32 %s217_s19, 4  ;;  %s42_s20 = int_to_ptr.vmem [resolvable:$true] %s41_s20 }
   0x8   :  { %47 = dma.hbm_to_vmem [thread:$0]  %s40_s16, 256, %s42_s20, [#allocation6], %s215_s17, %s215_s17, %s216_s18  }
   0x9   :  { %208 = dma.done.wait [#allocation3], 256  }
   0xa   :  { %209 = vsyncadd [#allocation3], 4294967040 }
   0xb   :  { %210 = dma.done.wait [#allocation6], 256  }
   0xc   :  { %211 = vsyncadd [#allocation6], 4294967040  ;;  %v70_v0 = vld [vmem:[#allocation2] sm:$0xff]  ;;  %v71_v1 = vld [vmem:[#allocation2 + $0x8] sm:$0xff]  ;;  %s218_s0 = smov [#allocation7]   ;;  %s111_s23 = sshll.u32 %s245_s2, 4  ;;  %s112_s23 = int_to_ptr.hbm [resolvable:$true] %s111_s23 }
   0xd   :  { %v72_v2 = vld [vmem:[#allocation5] sm:$0xff]  ;;  %v73_v3 = vld [vmem:[#allocation5 + $0x8] sm:$0xff]  ;;  %v74_v4 = vmax.f32 %v70_v0, 0.0001  ;;  %v75_v5 = vmax.f32 %v71_v1, 0.0001 }
   0xe   :  { %vm78_vm0 = vcmp.gt.f32.partialorder %v72_v2, 0.0  ;;  %vm79_vm1 = vcmp.gt.f32.partialorder %v73_v3, 0.0  ;;  %s109_s1 = sshll.u32 %s218_s0, 4  ;;  %s110_s1 = int_to_ptr.vmem [resolvable:$true] %s109_s1 }
   0xf   :  { %v76_v6 = vmin.f32 %v74_v4, 0.9999  ;;  %v77_v7 = vmin.f32 %v75_v5, 0.9999 }
  0x11   :  { %v80_v8 = vsub.f32 1.0, %v76_v6  ;;  %v81_v9 = vsub.f32 1.0, %v77_v7 }
  0x13   :  { %v82_v10 = vsel %vm78_vm0, %v76_v6, %v80_v8  ;;  %v83_v11 = vsel %vm79_vm1, %v77_v7, %v81_v9  ;;  %v84_v12 = vsel %vm78_vm0, %v80_v8, %v76_v6  ;;  %v85_v13 = vsel %vm79_vm1, %v81_v9, %v77_v7 }
  0x14   :  { %132 = vlog2.f32 %v82_v10  ;;  %v86_v14 = vmul.f32 %v84_v12, %v84_v12  ;;  %v87_v16 = vmul.f32 %v85_v13, %v85_v13 }
  0x15   :  { %134 = vlog2.f32 %v83_v11 }
  0x1a   :  { %v133_v15 = vpop.eup %132 }
  0x1b   :  { %v135_v17 = vpop.eup %134  ;;  %v89_v18 = vmul.f32 0.6931472, %v133_v15 }
  0x1c   :  { %v91_v19 = vmul.f32 0.6931472, %v135_v17 }
  0x1d   :  { %v92_v20 = vmul.f32 %v89_v18, %v86_v14 }
  0x1e   :  { %v93_v21 = vmul.f32 %v91_v19, %v87_v16 }
  0x1f   :  { %v94_v22 = vsub.f32 0.0, %v92_v20 }
  0x20   :  { %v95_v23 = vsub.f32 0.0, %v93_v21 }
  0x22   :  { %v101_v24 = vadd.f32 %v95_v23, %v94_v22 }
  0x24   :  { %103 = vst [vmem:[#allocation7] sm:$0xff] %v101_v24 }
  0x25   :  { %114 = dma.vmem_to_hbm [thread:$0]  %s110_s1, 128, %s112_s23, [#allocation4]  }
  0x26   :  { %212 = dma.done.wait [#allocation4], 128  }
  0x27   :  { %213 = vsyncadd [#allocation4], 4294967168 }
  0x28   :  { %119 = vsyncpa [#allocation3], 1 }
  0x29   :  { %120 = vsyncpa [#allocation6], 1 }
  0x2a   :  { %121 = vsyncpa [#allocation4], 1 }

</bundles_post_ra>
